<compile_context>
chip_gen: v5e
topology: v5e:2x2
jax: 0.10.0
libtpu: 0.0.40
codegen_flags: <defaults>
</compile_context>

<pallas_src>
import functools

import jax
import jax.numpy as jnp
from jax import lax
from jax.experimental import pallas as pl
from jax.experimental.pallas import tpu as pltpu

LN_EPS = 1e-5


def _round_up(n: int, m: int) -> int:
    return ((n + m - 1) // m) * m


def cross_pooler_kernel(x_ref, gamma_ref, beta_ref, w_ref, b_ref, o_ref):
    # x_ref:     (tm, H)  first-token slab for this batch tile
    # gamma_ref: (1, H)   LayerNorm weight
    # beta_ref:  (1, H)   LayerNorm bias
    # w_ref:     (H, H)   dense weight, nn.Linear layout (out, in) -- NOT transposed
    # b_ref:     (1, H)   dense bias
    # o_ref:     (tm, H)  output tile

    x0 = x_ref[...].astype(jnp.float32)                     # (tm, H)

    # LayerNorm over hidden dim (f32 accumulation).
    mean = jnp.mean(x0, axis=-1, keepdims=True)
    centered = x0 - mean
    var = jnp.mean(centered * centered, axis=-1, keepdims=True)
    h = centered * lax.rsqrt(var + LN_EPS) * gamma_ref[...] + beta_ref[...]

    # Dense: h @ W.T  == contract last dim of h with last dim of W (MXU trans_b,
    # no XLU transpose). Accumulate in f32 regardless of operand dtype.
    y = lax.dot_general(
        h.astype(w_ref.dtype), w_ref[...],
        dimension_numbers=(((1,), (1,)), ((), ())),
        preferred_element_type=jnp.float32,
    )
    y = y + b_ref[...].astype(jnp.float32)

    # QuickGELU: y * sigmoid(1.702 * y)  (EUP handles the sigmoid)
    act = y * jax.nn.sigmoid(1.702 * y)
    o_ref[...] = act.astype(o_ref.dtype)


@functools.partial(jax.jit, static_argnames=("block_b",))
def cross_pooler(hidden_states, ln_gamma, ln_beta, dense_w, dense_b, *,
                 block_b: int = 128):
    """hidden_states: (B, S, H); dense_w: (H_out, H_in) as stored by nn.Linear."""
    B, S, H = hidden_states.shape

    # Slice token 0 in the wrapper so only a (B, H) slab ever reaches the kernel.
    x0 = lax.slice_in_dim(hidden_states, 0, 1, axis=1).reshape(B, H)

    # Batch tile: multiple of 8 (sublane), capped at block_b; pad B so the grid
    # divides evenly and the output block is sublane-aligned.
    tm = min(block_b, _round_up(B, 8))
    b_pad = _round_up(B, tm)
    if b_pad != B:
        x0 = jnp.pad(x0, ((0, b_pad - B), (0, 0)))

    gamma2 = ln_gamma.reshape(1, H)
    beta2 = ln_beta.reshape(1, H)
    bias2 = dense_b.reshape(1, H)

    grid = (b_pad // tm,)
    itemsize = jnp.dtype(hidden_states.dtype).itemsize
    cost = pl.CostEstimate(
        flops=2 * b_pad * H * H + 8 * b_pad * H,
        transcendentals=b_pad * (H + 1),
        bytes_accessed=(2 * b_pad * H + 3 * H) * itemsize
        + H * H * jnp.dtype(dense_w.dtype).itemsize,
    )

    out = pl.pallas_call(
        cross_pooler_kernel,
        out_shape=jax.ShapeDtypeStruct((b_pad, H), hidden_states.dtype),
        grid_spec=pltpu.PrefetchScalarGridSpec(
            num_scalar_prefetch=0,
            grid=grid,
            in_specs=[
                pl.BlockSpec((tm, H), lambda i: (i, 0)),   # x tile (pipelined)
                pl.BlockSpec((1, H), lambda i: (0, 0)),    # gamma (resident)
                pl.BlockSpec((1, H), lambda i: (0, 0)),    # beta  (resident)
                pl.BlockSpec((H, H), lambda i: (0, 0)),    # W     (resident)
                pl.BlockSpec((1, H), lambda i: (0, 0)),    # bias  (resident)
            ],
            out_specs=pl.BlockSpec((tm, H), lambda i: (i, 0)),
        ),
        compiler_params=pltpu.CompilerParams(
            dimension_semantics=("parallel",),
        ),
        cost_estimate=cost,
    )(x0, gamma2, beta2, dense_w, bias2)

    return out[:B] if b_pad != B else out


def cross_pooler_ref(hidden_states, ln_gamma, ln_beta, dense_w, dense_b):
    x = hidden_states.astype(jnp.float32)
    mean = jnp.mean(x, axis=-1, keepdims=True)
    var = jnp.mean((x - mean) ** 2, axis=-1, keepdims=True)
    xn = (x - mean) / jnp.sqrt(var + LN_EPS)
    h = xn * ln_gamma + ln_beta
    p = h[:, 0]
    p = p @ dense_w.T + dense_b
    return p * jax.nn.sigmoid(1.702 * p)


def _run_case(key, B, S, H):
    k_x, k_g, k_b, k_w, k_bias = jax.random.split(key, 5)
    hidden_states = jax.random.normal(k_x, (B, S, H), dtype=jnp.float32)
    ln_gamma = 1.0 + 0.1 * jax.random.normal(k_g, (H,), dtype=jnp.float32)
    ln_beta = 0.1 * jax.random.normal(k_b, (H,), dtype=jnp.float32)
    dense_w = jax.random.normal(k_w, (H, H), dtype=jnp.float32) / jnp.sqrt(H)
    dense_b = 0.1 * jax.random.normal(k_bias, (H,), dtype=jnp.float32)

    out = cross_pooler(hidden_states, ln_gamma, ln_beta, dense_w, dense_b)
    out = jax.block_until_ready(out)

    ref = cross_pooler_ref(hidden_states, ln_gamma, ln_beta, dense_w, dense_b)
    assert out.shape == (B, H), out.shape
    assert jnp.allclose(out, ref, atol=1e-5, rtol=1e-5), (
        float(jnp.max(jnp.abs(out - ref)))
    )


if __name__ == "__main__":
    key = jax.random.PRNGKey(0)
    k0, k1 = jax.random.split(key)
    # Small shape consistent with the module (batch=2, seq=8, hidden=32).
    _run_case(k0, B=2, S=8, H=32)
    # Exercise batch padding + lane-width-128 hidden dim.
    _run_case(k1, B=9, S=4, H=128)
    print("KERNEL_OK")
</pallas_src>

<mosaic_0001>
module attributes {stable_mosaic.version = 11 : i64} {
  func.func @cross_pooler_kernel(%arg0: i32, %arg1: memref<8x32xf32, #tpu.memory_space<vmem>>, %arg2: memref<1x32xf32, #tpu.memory_space<vmem>>, %arg3: memref<1x32xf32, #tpu.memory_space<vmem>>, %arg4: memref<32x32xf32, #tpu.memory_space<vmem>>, %arg5: memref<1x32xf32, #tpu.memory_space<vmem>>, %arg6: memref<8x32xf32, #tpu.memory_space<vmem>>) attributes {dimension_semantics = [#tpu.dimension_semantics<parallel>], iteration_bounds = array<i64: 1>, scalar_prefetch = 0 : i64, scratch_operands = 0 : i64, tpu.core_type = #tpu.core_type<tc>, window_params = [{transform_indices = @transform_0, window_bounds = array<i64: 8, 32>}, {pipeline_mode = #tpu.pipeline_mode<synchronous>, transform_indices = @transform_1, window_bounds = array<i64: 1, 32>}, {pipeline_mode = #tpu.pipeline_mode<synchronous>, transform_indices = @transform_2, window_bounds = array<i64: 1, 32>}, {pipeline_mode = #tpu.pipeline_mode<synchronous>, transform_indices = @transform_3, window_bounds = array<i64: 32, 32>}, {pipeline_mode = #tpu.pipeline_mode<synchronous>, transform_indices = @transform_4, window_bounds = array<i64: 1, 32>}, {transform_indices = @transform_5, window_bounds = array<i64: 8, 32>}]} {
    %c0 = arith.constant 0 : index
    %c0_0 = arith.constant 0 : index
    %0 = vector.load %arg1[%c0, %c0_0] : memref<8x32xf32, #tpu.memory_space<vmem>>, vector<8x32xf32>
    %cst = arith.constant dense<0.000000e+00> : vector<8xf32>
    %1 = vector.multi_reduction <add>, %0, %cst [1] : vector<8x32xf32> to vector<8xf32>
    %2 = vector.shape_cast %1 : vector<8xf32> to vector<8x1xf32>
    %cst_1 = arith.constant 3.200000e+01 : f32
    %3 = vector.broadcast %cst_1 : f32 to vector<8x1xf32>
    %4 = arith.divf %2, %3 : vector<8x1xf32>
    %5 = vector.broadcast %4 : vector<8x1xf32> to vector<8x32xf32>
    %6 = arith.subf %0, %5 : vector<8x32xf32>
    %7 = arith.mulf %6, %6 : vector<8x32xf32>
    %cst_2 = arith.constant dense<0.000000e+00> : vector<8xf32>
    %8 = vector.multi_reduction <add>, %7, %cst_2 [1] : vector<8x32xf32> to vector<8xf32>
    %9 = vector.shape_cast %8 : vector<8xf32> to vector<8x1xf32>
    %cst_3 = arith.constant 3.200000e+01 : f32
    %10 = vector.broadcast %cst_3 : f32 to vector<8x1xf32>
    %11 = arith.divf %9, %10 : vector<8x1xf32>
    %cst_4 = arith.constant 9.99999974E-6 : f32
    %12 = vector.broadcast %cst_4 : f32 to vector<8x1xf32>
    %13 = arith.addf %11, %12 : vector<8x1xf32>
    %14 = math.rsqrt %13 : vector<8x1xf32>
    %15 = vector.broadcast %14 : vector<8x1xf32> to vector<8x32xf32>
    %16 = arith.mulf %6, %15 : vector<8x32xf32>
    %c0_5 = arith.constant 0 : index
    %c0_6 = arith.constant 0 : index
    %17 = vector.load %arg2[%c0_5, %c0_6] : memref<1x32xf32, #tpu.memory_space<vmem>>, vector<1x32xf32>
    %18 = vector.broadcast %17 : vector<1x32xf32> to vector<8x32xf32>
    %19 = arith.mulf %16, %18 : vector<8x32xf32>
    %c0_7 = arith.constant 0 : index
    %c0_8 = arith.constant 0 : index
    %20 = vector.load %arg3[%c0_7, %c0_8] : memref<1x32xf32, #tpu.memory_space<vmem>>, vector<1x32xf32>
    %21 = vector.broadcast %20 : vector<1x32xf32> to vector<8x32xf32>
    %22 = arith.addf %19, %21 : vector<8x32xf32>
    %c0_9 = arith.constant 0 : index
    %c0_10 = arith.constant 0 : index
    %23 = vector.load %arg4[%c0_9, %c0_10] : memref<32x32xf32, #tpu.memory_space<vmem>>, vector<32x32xf32>
    %cst_11 = arith.constant dense<0.000000e+00> : vector<8x32xf32>
    %24 = tpu.matmul %22, %23, %cst_11 {dimension_numbers = #tpu.dot_dimension_numbers<[1], [1], [0], [0], [0, 0, 1, 0], [], []>} : vector<8x32xf32>, vector<32x32xf32>, vector<8x32xf32> -> vector<8x32xf32>
    %c0_12 = arith.constant 0 : index
    %c0_13 = arith.constant 0 : index
    %25 = vector.load %arg5[%c0_12, %c0_13] : memref<1x32xf32, #tpu.memory_space<vmem>>, vector<1x32xf32>
    %26 = vector.broadcast %25 : vector<1x32xf32> to vector<8x32xf32>
    %27 = arith.addf %24, %26 : vector<8x32xf32>
    %cst_14 = arith.constant 1.702000e+00 : f32
    %28 = vector.broadcast %cst_14 : f32 to vector<8x32xf32>
    %29 = arith.mulf %28, %27 : vector<8x32xf32>
    %30 = arith.negf %29 : vector<8x32xf32>
    %31 = math.exp %30 : vector<8x32xf32>
    %cst_15 = arith.constant 1.000000e+00 : f32
    %32 = vector.broadcast %cst_15 : f32 to vector<8x32xf32>
    %33 = arith.addf %32, %31 : vector<8x32xf32>
    %34 = arith.divf %32, %33 : vector<8x32xf32>
    %35 = arith.mulf %27, %34 : vector<8x32xf32>
    %c0_16 = arith.constant 0 : index
    %c0_17 = arith.constant 0 : index
    %36 = vector.load %arg6[%c0_16, %c0_17] : memref<8x32xf32, #tpu.memory_space<vmem>>, vector<8x32xf32>
    tpu.vector_store %arg6[%c0_16, %c0_17], %35 {strides = array<i32>} : memref<8x32xf32, #tpu.memory_space<vmem>>, vector<8x32xf32>,
    return
  }
  func.func @transform_0(%arg0: i32) -> (i32, i32) {
    %c0_i32 = arith.constant 0 : i32
    %c0_i32_0 = arith.constant 0 : i32
    return %arg0, %c0_i32 : i32, i32
  }
  func.func @transform_1(%arg0: i32) -> (i32, i32) {
    %c0_i32 = arith.constant 0 : i32
    %c0_i32_0 = arith.constant 0 : i32
    %c0_i32_1 = arith.constant 0 : i32
    return %c0_i32, %c0_i32_0 : i32, i32
  }
  func.func @transform_2(%arg0: i32) -> (i32, i32) {
    %c0_i32 = arith.constant 0 : i32
    %c0_i32_0 = arith.constant 0 : i32
    %c0_i32_1 = arith.constant 0 : i32
    return %c0_i32, %c0_i32_0 : i32, i32
  }
  func.func @transform_3(%arg0: i32) -> (i32, i32) {
    %c0_i32 = arith.constant 0 : i32
    %c0_i32_0 = arith.constant 0 : i32
    %c0_i32_1 = arith.constant 0 : i32
    return %c0_i32, %c0_i32_0 : i32, i32
  }
  func.func @transform_4(%arg0: i32) -> (i32, i32) {
    %c0_i32 = arith.constant 0 : i32
    %c0_i32_0 = arith.constant 0 : i32
    %c0_i32_1 = arith.constant 0 : i32
    return %c0_i32, %c0_i32_0 : i32, i32
  }
  func.func @transform_5(%arg0: i32) -> (i32, i32) {
    %c0_i32 = arith.constant 0 : i32
    %c0_i32_0 = arith.constant 0 : i32
    return %arg0, %c0_i32 : i32, i32
  }
}

</mosaic_0001>

<bundles_post_ra>
// kernel: cross_pooler.1
= control target key start
LH: loop header
LB: loop body
LE: loop exit
PB: predicated region body
PF: predicated region fallthrough
CT: control target
= control target key end

     0   :  { %10 = vsyncpa [#allocation3], 0  ;;  %s194_s21 = smov [#allocation2]   ;;  %s195_s23 = smov 128   ;;  %s254_s0 = inlined_call_operand.vmem [shape: f32[8,32], index: 0, kind: input, shape index: {}]   ;;  %s255_s1 = inlined_call_operand.vmem [shape: f32[1,32], index: 1, kind: input, shape index: {}]   ;;  %s256_s2 = inlined_call_operand.vmem [shape: f32[1,32], index: 2, kind: input, shape index: {}]   ;;  %s257_s3 = inlined_call_operand.hbm [shape: f32[32,32], index: 3, kind: input, shape index: {}]   ;;  %s258_s4 = inlined_call_operand.vmem [shape: f32[1,32], index: 4, kind: input, shape index: {}]   ;;  %s259_s5 = inlined_call_operand.vmem [shape: f32[8,32], index: 5, kind: output, shape index: {}]  }
   0x1   :  { %s21_s20 = sshll.u32 %s257_s3, 4  ;;  %s23_s22 = sshll.u32 %s194_s21, 4  ;;  %s22_s20 = int_to_ptr.hbm [resolvable:$true] %s21_s20  ;;  %s24_s22 = int_to_ptr.vmem [resolvable:$true] %s23_s22 }
   0x2   :  { %s196_s24 = smov 8  }
   0x3   :  { %29 = dma.hbm_to_vmem [thread:$0]  %s22_s20, 512, %s24_s22, [#allocation3], %s195_s23, %s195_s23, %s196_s24  }
   0x4   :  { %192 = dma.done.wait [#allocation3], 512  }
   0x5   :  { %193 = vsyncadd [#allocation3], 4294966784  ;;  %vm37_vm0 = vcmask 261120   ;;  %v36_v0 = vld [vmem:[%s254_s0] sm:$0xff]  ;;  %v197_v2 = vmov 32.0   ;;  %v80_v14 = vld [vmem:[#allocation2 + $0x18] sm:$0xff] }
   0x6   :  { %v38_v1 = vsel %vm37_vm0, %v36_v0, 0.0  ;;  %160 = vrcp.f32 %v197_v2  ;;  %147 = vmatpush.xpose.msk.msra.mxu0 %vm37_vm0, %v80_v14  ;;  %v79_v15 = vld [vmem:[#allocation2 + $0x10] sm:$0xff]  ;;  %v78_v16 = vld [vmem:[#allocation2 + $0x8] sm:$0xff]  ;;  %v77_v17 = vld [vmem:[#allocation2] sm:$0xff] }
   0x7   :  { %39 = vadd.xlane.f32.xlu0 %v38_v1  ;;  %v157_v27 = vld [vmem:[%s255_s1] ss:$0 sm:$0xff] }
   0x8   :  { %v158_v30 = vld [vmem:[%s256_s2] ss:$0 sm:$0xff] }
   0x9   :  { %v159_v33 = vld [vmem:[%s258_s4] ss:$0 sm:$0xff] }
   0xa   :  { %148 = vmatpush.xpose.msk.msra.mxu0 %vm37_vm0, %v79_v15 }
   0xc   :  { %v161_v3 = vpop.eup %160 }
   0xd   :  { %v42_v4 = vmul.f32 32.0, %v161_v3  ;;  %vm46_vm1 = vweird.f32 %v161_v3 }
   0xe   :  { %149 = vmatpush.xpose.msk.msra.mxu0 %vm37_vm0, %v78_v16 }
   0xf   :  { %v43_v5 = vsub.f32 1.0, %v42_v4 }
  0x11   :  { %v44_v6 = vmul.f32 %v161_v3, %v43_v5 }
  0x12   :  { %150 = vmatpush.xpose.msk.msra.mxu0 %vm37_vm0, %v77_v17 }
  0x13   :  { %v45_v7 = vadd.f32 %v161_v3, %v44_v6 }
  0x15   :  { %v47_v8 = vsel %vm46_vm1, %v161_v3, %v45_v7 }
  0x7a   :  { %v40_v9 = vpop.xlane.xlu0 %39 }
  0x7b   :  { %v48_v10 = vmul.f32 %v47_v8, %v40_v9 }
  0x7d   :  { %v49_v11 = vsub.f32 %v36_v0, %v48_v10 }
  0x7f   :  { %v50_v12 = vmul.f32 %v49_v11, %v49_v11 }
  0x81   :  { %v51_v13 = vsel %vm37_vm0, %v50_v12, 0.0 }
  0x82   :  { %52 = vadd.xlane.f32.xlu0 %v51_v13 }
  0xf5   :  { %v53_v18 = vpop.xlane.xlu0 %52 }
  0xf6   :  { %v54_v19 = vmul.f32 %v53_v18, %v47_v8 }
  0xf8   :  { %v55_v20 = vadd.f32 1e-05, %v54_v19 }
  0xfa   :  { %162 = vrsqrt.f32 %v55_v20  ;;  %vm62_vm3 = vweird.f32 %v55_v20 }
 0x100   :  { %v163_v21 = vpop.eup %162 }
 0x101   :  { %v57_v22 = vmul.f32 %v163_v21, %v55_v20  ;;  %vm63_vm2 = vweird.f32 %v163_v21 }
 0x102   :  { %vm64_vm4 = vmor %vm62_vm3, %vm63_vm2 }
 0x103   :  { %v58_v23 = vmul.f32 %v163_v21, %v57_v22 }
 0x105   :  { %v59_v24 = vmul.f32 0.5, %v58_v23 }
 0x107   :  { %v60_v25 = vsub.f32 1.5, %v59_v24 }
 0x109   :  { %v61_v26 = vmul.f32 %v163_v21, %v60_v25 }
 0x10b   :  { %v65_v28 = vsel %vm64_vm4, %v163_v21, %v61_v26 }
 0x10c   :  { %v66_v29 = vmul.f32 %v65_v28, %v49_v11 }
 0x10e   :  { %v71_v31 = vmul.f32 %v157_v27, %v66_v29 }
 0x110   :  { %v76_v32 = vadd.f32 %v158_v30, %v71_v31 }
 0x112   :  { %151 = vmatmul.msk.f32.vlgmr.msra.gmra.mxu0 %vm37_vm0, %v76_v32 }
 0x18f   :  { %v117_v34 = vpop.f32.mrf.mxu0 }
 0x190   :  { %v118_v35 = vadd.f32 %v159_v33, %v117_v34 }
 0x192   :  { %v152_v36 = vmul.f32 -1.702, %v118_v35 }
 0x194   :  { %v122_v37 = vmul.f32 1.442695, %v152_v36 }
 0x196   :  { %164 = vpow2.f32 %v122_v37 }
 0x19c   :  { %v165_v38 = vpop.eup %164 }
 0x19d   :  { %v124_v39 = vadd.f32 1.0, %v165_v38 }
 0x19f   :  { %166 = vrcp.f32 %v124_v39  ;;  %v136_v43 = vand.u32 2147483648, %v124_v39  ;;  %v134_v45 = vand.u32 2147483647, %v124_v39  ;;  %vm130_vm6 = vweird.f32 %v124_v39 }
 0x1a1   :  { %v137_v47 = vor.u32 1.1754944e-38, %v136_v43  ;;  %vm135_vm8 = vcmp.eq.f32.partialorder %v134_v45, 8.507059e+37 }
 0x1a5   :  { %v167_v40 = vpop.eup %166 }
 0x1a6   :  { %v126_v41 = vmul.f32 %v167_v40, %v124_v39  ;;  %vm131_vm5 = vweird.f32 %v167_v40 }
 0x1a7   :  { %vm132_vm7 = vmor %vm130_vm6, %vm131_vm5 }
 0x1a8   :  { %v127_v42 = vsub.f32 1.0, %v126_v41 }
 0x1aa   :  { %v128_v44 = vmul.f32 %v167_v40, %v127_v42 }
 0x1ac   :  { %v129_v46 = vadd.f32 %v167_v40, %v128_v44 }
 0x1ae   :  { %v133_v48 = vsel %vm132_vm7, %v167_v40, %v129_v46 }
 0x1af   :  { %v138_v49 = vsel %vm135_vm8, %v137_v47, %v133_v48 }
 0x1b0   :  { %v140_v50 = vmul.f32 %v138_v49, %v118_v35 }
 0x1b2   :  { %141 = vst.msk [vmem:[%s259_s5] sm:$0xff] %vm37_vm0, %v140_v50 }
 0x1b3   :  { %146 = vsyncpa [#allocation3], 1 }

</bundles_post_ra>
